<compile_context>
chip_gen: v6e
topology: v6e:2x2x1
jax: 0.10.0
libtpu: 0.0.40
codegen_flags: <defaults>
</compile_context>

<pallas_src>
import functools

import jax
import jax.numpy as jnp
from jax.experimental import pallas as pl
from jax.experimental.pallas import tpu as pltpu


def _critic_kernel(state_ref, act_ref, slab_ref, o_ref, *, S, A, L):
    # Static row offsets into the packed weight slab (static slices are cheap).
    r = 0
    w1s = slab_ref[r:r + S, :]; r += S          # (S, L)
    w1a = slab_ref[r:r + A, :]; r += A          # (A, L)
    b1 = slab_ref[r:r + 1, :]; r += 1           # (1, L)
    w2 = slab_ref[r:r + L, :]; r += L           # (L, L)  already I + T*W2_x
    b2 = slab_ref[r:r + 1, :]; r += 1           # (1, L)  already T*b2
    w3 = slab_ref[r:r + 1, :]; r += 1           # (1, L)  fc3 weight as a row
    b3 = slab_ref[r:r + 1, 0:1]                 # (1, 1)  fc3 bias

    # fc1 + relu  (split matmul == Linear applied to cat([state, action]))
    h1 = (jnp.dot(state_ref[...], w1s, preferred_element_type=jnp.float32)
          + jnp.dot(act_ref[...], w1a, preferred_element_type=jnp.float32)
          + b1)
    h1 = jnp.maximum(h1, 0.0)                   # (TB, L)

    # fc2 + relu  (Euler step / plain Linear pre-folded into w2, b2)
    h2 = jnp.dot(h1, w2, preferred_element_type=jnp.float32) + b2
    h2 = jnp.maximum(h2, 0.0)                   # (TB, L)

    # fc3: output width 1 -> lane reduction (XLU) instead of a degenerate
    # MXU pass; store is a single (TB, 1) column.
    o_ref[...] = jnp.sum(h2 * w3, axis=-1, keepdims=True) + b3


def critic_forward(state, action, params, integration_right_limit, *, block_b=512):
    """Pallas-backed forward pass of the DDPG critic.

    state : (B, S) f32,  action : (B, A) f32
    params: (in, out)-layout weights / (1, out) biases:
        w1 (S+A, L), b1 (1, L),
        w2 (L+1, L) for the ODE branch or (L, L) for the plain-Linear branch,
        b2 (1, L), w3 (L, 1), b3 (1, 1)
    """
    B, S = state.shape
    A = action.shape[1]
    L = params["w1"].shape[1]

    # ---- fold fc2 into a single (L, L) matmul (once, outside the kernel) ----
    if float(integration_right_limit) == -1.0:          # plain nn.Linear(L, L)
        w2_eff = params["w2"].astype(jnp.float32)
        b2_eff = params["b2"].astype(jnp.float32)
    else:                                               # MLP_ODE: one Euler step at t = 0
        T = jnp.float32(integration_right_limit)
        w2_x = params["w2"][1:, :]                      # t column is multiplied by 0 -> dropped
        w2_eff = jnp.eye(L, dtype=jnp.float32) + T * w2_x
        b2_eff = T * params["b2"]

    w1 = params["w1"]
    w3_row = params["w3"].reshape(L, 1).T                       # (1, L)
    b3_row = jnp.broadcast_to(params["b3"].reshape(1, 1), (1, L))

    # One VMEM slab instead of 8 tiny operands (cuts per-operand DMA setup).
    slab = jnp.concatenate(
        [w1[:S, :], w1[S:, :], params["b1"], w2_eff, b2_eff, w3_row, b3_row],
        axis=0).astype(jnp.float32)                             # (S + A + L + 4, L)

    # ---- batch tiling: full batch if small, otherwise 8-aligned tiles ----
    tb = B if B <= block_b else max(8, (block_b // 8) * 8)
    grid = (pl.cdiv(B, tb),)

    kernel = functools.partial(_critic_kernel, S=S, A=A, L=L)
    return pl.pallas_call(
        kernel,
        out_shape=jax.ShapeDtypeStruct((B, 1), jnp.float32),
        grid=grid,
        in_specs=[
            pl.BlockSpec((tb, S), lambda i: (i, 0)),            # state tile
            pl.BlockSpec((tb, A), lambda i: (i, 0)),            # action tile
            pl.BlockSpec(slab.shape, lambda i: (0, 0)),         # VMEM-resident weights
        ],
        out_specs=pl.BlockSpec((tb, 1), lambda i: (i, 0)),
        compiler_params=pltpu.CompilerParams(
            dimension_semantics=("parallel",)),
    )(state, action, slab)


def init_params(key, state_size, action_size, layer_size, integration_right_limit):
    """Deterministic PyTorch-style uniform(+-1/sqrt(fan_in)) init, (in,out) layout."""
    def linear(k, fan_in, fan_out):
        kw, kb = jax.random.split(k)
        bound = 1.0 / jnp.sqrt(jnp.float32(fan_in))
        w = jax.random.uniform(kw, (fan_in, fan_out), jnp.float32, -bound, bound)
        b = jax.random.uniform(kb, (1, fan_out), jnp.float32, -bound, bound)
        return w, b

    k1, k2, k3 = jax.random.split(key, 3)
    w1, b1 = linear(k1, state_size + action_size, layer_size)       # fc1
    if float(integration_right_limit) == -1.0:
        w2, b2 = linear(k2, layer_size, layer_size)                 # fc2: plain Linear
    else:
        w2, b2 = linear(k2, layer_size + 1, layer_size)             # fc2: ConcatLinear
    w3, b3 = linear(k3, layer_size, 1)                              # fc3
    return {"w1": w1, "b1": b1, "w2": w2, "b2": b2, "w3": w3, "b3": b3}


def critic_reference(state, action, params, integration_right_limit):
    """Pure-JAX reference mirroring the PyTorch forward (no algebraic folds)."""
    x = jnp.concatenate([state, action], axis=1)
    h1 = jax.nn.relu(x @ params["w1"] + params["b1"])
    if float(integration_right_limit) == -1.0:
        h2_pre = h1 @ params["w2"] + params["b2"]
    else:
        tt = jnp.zeros_like(h1[:, :1])                              # t = 0
        ttx = jnp.concatenate([tt, h1], axis=1)
        f0 = ttx @ params["w2"] + params["b2"]
        h2_pre = h1 + integration_right_limit * f0
    h2 = jax.nn.relu(h2_pre)
    return h2 @ params["w3"] + params["b3"]


if __name__ == "__main__":
    B, STATE, ACTION, LAYER = 8, 12, 4, 32
    key = jax.random.PRNGKey(0)
    kp, ks, ka = jax.random.split(key, 3)
    state = jax.random.normal(ks, (B, STATE), jnp.float32)
    action = jax.random.normal(ka, (B, ACTION), jnp.float32)

    # --- ODE branch (MLP_ODE as fc2) ---
    T_ODE = 1.0
    params_ode = init_params(kp, STATE, ACTION, LAYER, T_ODE)
    out = jax.block_until_ready(critic_forward(state, action, params_ode, T_ODE))
    ref = critic_reference(state, action, params_ode, T_ODE)
    assert out.shape == (B, 1)
    assert jnp.allclose(out, ref, atol=1e-5, rtol=1e-5), (out, ref)

    # --- plain Linear branch (INTEGRATION_RIGHT_LIMIT == -1.0) ---
    T_LIN = -1.0
    params_lin = init_params(kp, STATE, ACTION, LAYER, T_LIN)
    out2 = jax.block_until_ready(critic_forward(state, action, params_lin, T_LIN))
    ref2 = critic_reference(state, action, params_lin, T_LIN)
    assert out2.shape == (B, 1)
    assert jnp.allclose(out2, ref2, atol=1e-5, rtol=1e-5), (out2, ref2)

    print("KERNEL_OK")
</pallas_src>

<mosaic_0001>
module attributes {stable_mosaic.version = 11 : i64} {
  func.func @_critic_kernel(%arg0: i32, %arg1: memref<8x12xf32, #tpu.memory_space<vmem>>, %arg2: memref<8x4xf32, #tpu.memory_space<vmem>>, %arg3: memref<52x32xf32, #tpu.memory_space<vmem>>, %arg4: memref<8x1xf32, #tpu.memory_space<vmem>>) attributes {dimension_semantics = [#tpu.dimension_semantics<parallel>], iteration_bounds = array<i64: 1>, scalar_prefetch = 0 : i64, scratch_operands = 0 : i64, tpu.core_type = #tpu.core_type<tc>, window_params = [{transform_indices = @transform_0, window_bounds = array<i64: 8, 12>}, {transform_indices = @transform_1, window_bounds = array<i64: 8, 4>}, {pipeline_mode = #tpu.pipeline_mode<synchronous>, transform_indices = @transform_2, window_bounds = array<i64: 52, 32>}, {transform_indices = @transform_3, window_bounds = array<i64: 8, 1>}]} {
    %c0 = arith.constant 0 : index
    %c0_0 = arith.constant 0 : index
    %0 = vector.load %arg3[%c0, %c0_0] : memref<52x32xf32, #tpu.memory_space<vmem>>, vector<12x32xf32>
    %c12 = arith.constant 12 : index
    %c0_1 = arith.constant 0 : index
    %1 = vector.load %arg3[%c12, %c0_1] : memref<52x32xf32, #tpu.memory_space<vmem>>, vector<4x32xf32>
    %c16 = arith.constant 16 : index
    %c0_2 = arith.constant 0 : index
    %2 = vector.load %arg3[%c16, %c0_2] : memref<52x32xf32, #tpu.memory_space<vmem>>, vector<1x32xf32>
    %c17 = arith.constant 17 : index
    %c0_3 = arith.constant 0 : index
    %3 = vector.load %arg3[%c17, %c0_3] : memref<52x32xf32, #tpu.memory_space<vmem>>, vector<32x32xf32>
    %c49 = arith.constant 49 : index
    %c0_4 = arith.constant 0 : index
    %4 = vector.load %arg3[%c49, %c0_4] : memref<52x32xf32, #tpu.memory_space<vmem>>, vector<1x32xf32>
    %c50 = arith.constant 50 : index
    %c0_5 = arith.constant 0 : index
    %5 = vector.load %arg3[%c50, %c0_5] : memref<52x32xf32, #tpu.memory_space<vmem>>, vector<1x32xf32>
    %c51 = arith.constant 51 : index
    %c0_6 = arith.constant 0 : index
    %6 = vector.load %arg3[%c51, %c0_6] : memref<52x32xf32, #tpu.memory_space<vmem>>, vector<1x1xf32>
    %c0_7 = arith.constant 0 : index
    %c0_8 = arith.constant 0 : index
    %7 = vector.load %arg1[%c0_7, %c0_8] : memref<8x12xf32, #tpu.memory_space<vmem>>, vector<8x12xf32>
    %cst = arith.constant dense<0.000000e+00> : vector<8x32xf32>
    %8 = tpu.matmul %7, %0, %cst {dimension_numbers = #tpu.dot_dimension_numbers<[1], [0], [0], [1], [0, 0, 1, 1], [], []>} : vector<8x12xf32>, vector<12x32xf32>, vector<8x32xf32> -> vector<8x32xf32>
    %c0_9 = arith.constant 0 : index
    %c0_10 = arith.constant 0 : index
    %9 = vector.load %arg2[%c0_9, %c0_10] : memref<8x4xf32, #tpu.memory_space<vmem>>, vector<8x4xf32>
    %cst_11 = arith.constant dense<0.000000e+00> : vector<8x32xf32>
    %10 = tpu.matmul %9, %1, %cst_11 {dimension_numbers = #tpu.dot_dimension_numbers<[1], [0], [0], [1], [0, 0, 1, 1], [], []>} : vector<8x4xf32>, vector<4x32xf32>, vector<8x32xf32> -> vector<8x32xf32>
    %11 = arith.addf %8, %10 : vector<8x32xf32>
    %12 = vector.broadcast %2 : vector<1x32xf32> to vector<8x32xf32>
    %13 = arith.addf %11, %12 : vector<8x32xf32>
    %cst_12 = arith.constant 0.000000e+00 : f32
    %14 = vector.broadcast %cst_12 : f32 to vector<8x32xf32>
    %15 = arith.maximumf %13, %14 : vector<8x32xf32>
    %cst_13 = arith.constant dense<0.000000e+00> : vector<8x32xf32>
    %16 = tpu.matmul %15, %3, %cst_13 {dimension_numbers = #tpu.dot_dimension_numbers<[1], [0], [0], [1], [0, 0, 1, 1], [], []>} : vector<8x32xf32>, vector<32x32xf32>, vector<8x32xf32> -> vector<8x32xf32>
    %17 = vector.broadcast %4 : vector<1x32xf32> to vector<8x32xf32>
    %18 = arith.addf %16, %17 : vector<8x32xf32>
    %cst_14 = arith.constant 0.000000e+00 : f32
    %19 = vector.broadcast %cst_14 : f32 to vector<8x32xf32>
    %20 = arith.maximumf %18, %19 : vector<8x32xf32>
    %21 = vector.broadcast %5 : vector<1x32xf32> to vector<8x32xf32>
    %22 = arith.mulf %20, %21 : vector<8x32xf32>
    %cst_15 = arith.constant dense<0.000000e+00> : vector<8xf32>
    %23 = vector.multi_reduction <add>, %22, %cst_15 [1] : vector<8x32xf32> to vector<8xf32>
    %24 = vector.shape_cast %23 : vector<8xf32> to vector<8x1xf32>
    %25 = vector.broadcast %6 : vector<1x1xf32> to vector<8x1xf32>
    %26 = arith.addf %24, %25 : vector<8x1xf32>
    %c0_16 = arith.constant 0 : index
    %c0_17 = arith.constant 0 : index
    %27 = vector.load %arg4[%c0_16, %c0_17] : memref<8x1xf32, #tpu.memory_space<vmem>>, vector<8x1xf32>
    tpu.vector_store %arg4[%c0_16, %c0_17], %26 {strides = array<i32>} : memref<8x1xf32, #tpu.memory_space<vmem>>, vector<8x1xf32>,
    return
  }
  func.func @transform_0(%arg0: i32) -> (i32, i32) {
    %c0_i32 = arith.constant 0 : i32
    %c0_i32_0 = arith.constant 0 : i32
    return %arg0, %c0_i32 : i32, i32
  }
  func.func @transform_1(%arg0: i32) -> (i32, i32) {
    %c0_i32 = arith.constant 0 : i32
    %c0_i32_0 = arith.constant 0 : i32
    return %arg0, %c0_i32 : i32, i32
  }
  func.func @transform_2(%arg0: i32) -> (i32, i32) {
    %c0_i32 = arith.constant 0 : i32
    %c0_i32_0 = arith.constant 0 : i32
    %c0_i32_1 = arith.constant 0 : i32
    return %c0_i32, %c0_i32_0 : i32, i32
  }
  func.func @transform_3(%arg0: i32) -> (i32, i32) {
    %c0_i32 = arith.constant 0 : i32
    %c0_i32_0 = arith.constant 0 : i32
    return %arg0, %c0_i32 : i32, i32
  }
}

</mosaic_0001>

<bundles_post_ra>
// kernel: tpu_custom_call.1
= control target key start
LH: loop header
LB: loop body
LE: loop exit
PB: predicated region body
PF: predicated region fallthrough
CT: control target
= control target key end

     0   :  { %vm31_vm0 = vcmask 1043456   ;;  %vm27_vm1 = vcmask 31744   ;;  %v330_v0 = vmov 0.0   ;;  %vm331_vm2 = vmmov 0   ;;  %s396_s2 = inlined_call_operand.vmem [shape: f32[52,32], index: 2, kind: input, shape index: {}]   ;;  %s397_s1 = inlined_call_operand.vmem [shape: f32[8,4], index: 1, kind: input, shape index: {}]   ;;  %s398_s0 = inlined_call_operand.vmem [shape: f32[8,12], index: 0, kind: input, shape index: {}]   ;;  %s399_s3 = inlined_call_operand.vmem [shape: f32[8,1], index: 3, kind: output, shape index: {}]  }
   0x1   :  { %305 = vmatprep.subr.mxu1 %v330_v0  ;;  %v16_v1 = vld [vmem:[%s396_s2 + $0xc] sm:$0xf]  ;;  %307 = vmatprep.mubr.msk.f32.mxu1 %vm331_vm2, %v330_v0  ;;  %v26_v2 = vld [vmem:[%s397_s1] sm:$0xff]  ;;  %v15_v3 = vld [vmem:[%s396_s2 + $0x8] sm:$0xf]  ;;  %vm105_vm3 = vcmask 97280  }
   0x2   :  { %306 = vmatpush3.msk.msra.mxu1 %vm31_vm0, %v16_v1  ;;  %317 = vmatprep.subr.mxu0 %v330_v0  ;;  %v14_v4 = vld [vmem:[%s396_s2] sm:$0xff]  ;;  %v21_v6 = vld [vmem:[%s396_s2 + $0x29] sm:$0xff]  ;;  %v18_v9 = vld [vmem:[%s396_s2 + $0x11] sm:$0xff]  ;;  %vm192_vm4 = vcmask 261120   ;;  %vm280_vm5 = vcmask 7168  }
   0x3   :  { %308 = vmatmul.mubr.msk.f32.vlgmr.msra.gmra.mxu1 %vm27_vm1, %v26_v2  ;;  %310 = vmatprep.subr.mxu1 %v330_v0  ;;  %v25_v5 = vld [vmem:[%s398_s0] sm:$0xff]  ;;  %v290_v12 = vld [vmem:[%s396_s2 + $0x10] ss:$0 sm:$0xff]  ;;  %v291_v18 = vld [vmem:[%s396_s2 + $0x31] ss:$0 sm:$0xff] }
   0x4   :  { %311 = vmatpush3.msk.msra.mxu1 %vm31_vm0, %v15_v3  ;;  %314 = vmatprep.mubr.msk.f32.mxu1 %vm331_vm2, %v330_v0  ;;  %v20_v7 = vld [vmem:[%s396_s2 + $0x21] sm:$0xff]  ;;  %v19_v8 = vld [vmem:[%s396_s2 + $0x19] sm:$0xff]  ;;  %v293_v22 = vld [vmem:[%s396_s2 + $0x32] ss:$0 sm:$0xff] }
   0x5   :  { %312 = vmatprep.subr.mxu1 %v330_v0  ;;  %325 = vmatprep.mubr.msk.f32.mxu0 %vm331_vm2, %v330_v0  ;;  %v294_v26 = vld [vmem:[%s396_s2 + $0x33] ss:$0 sm:$0xff] }
   0x6   :  { %313 = vmatpush3.msra.mxu1 %v14_v4  ;;  %318 = vmatpush3.msra.mxu0 %v21_v6 }
   0x7   :  { %315 = vmatmul.mubr.msk.f32.vlgmr.msra.gmra.mxu1 %vm105_vm3, %v25_v5  ;;  %319 = vmatprep.subr.mxu0 %v330_v0 }
   0x8   :  { %320 = vmatpush3.msra.mxu0 %v20_v7 }
   0x9   :  { %321 = vmatprep.subr.mxu0 %v330_v0 }
   0xa   :  { %322 = vmatpush3.msra.mxu0 %v19_v8 }
   0xb   :  { %323 = vmatprep.subr.mxu0 %v330_v0 }
   0xc   :  { %324 = vmatpush3.msra.mxu0 %v18_v9 }
  0xc3   :  { %v101_v10 = vpop.f32.mrf.mxu1 }
  0xc5   :  { %v309_v11 = vpop.f32.mrf.mxu1 }
  0xc7   :  { %v178_v13 = vpop.f32.mrf.mxu1 }
  0xc8   :  { %v179_v14 = vadd.f32 %v178_v13, %v101_v10 }
  0xc9   :  { %v316_v15 = vpop.f32.mrf.mxu1 }
  0xca   :  { %v186_v16 = vadd.f32 %v290_v12, %v179_v14 }
  0xcc   :  { %v187_v17 = vmax.f32 %v186_v16, 0.0 }
  0xce   :  { %326 = vmatmul.mubr.msk.f32.vlgmr.msra.gmra.mxu0 %vm192_vm4, %v187_v17 }
 0x18e   :  { %v262_v19 = vpop.f32.mrf.mxu0 }
 0x18f   :  { %v263_v20 = vadd.f32 %v291_v18, %v262_v19 }
 0x190   :  { %v327_v21 = vpop.f32.mrf.mxu0 }
 0x191   :  { %v266_v23 = vmax.f32 %v263_v20, 0.0 }
 0x193   :  { %v271_v24 = vmul.f32 %v293_v22, %v266_v23 }
 0x195   :  { %v272_v25 = vsel %vm192_vm4, %v271_v24, 0.0 }
 0x196   :  { %273 = vadd.xlane.f32.xlu0 %v272_v25 }
 0x21f   :  { %v274_v27 = vpop.xlane.xlu0 %273 }
 0x220   :  { %v279_v28 = vadd.f32 %v294_v26, %v274_v27 }
 0x222   :  { %281 = vst.msk [vmem:[%s399_s3] sm:$0xff] %vm280_vm5, %v279_v28 }

</bundles_post_ra>
